<compile_context>
chip_gen: v7x
topology: tpu7x:2x2x1
jax: 0.10.0
libtpu: 0.0.40
codegen_flags: <defaults>
</compile_context>

<pallas_src>
import jax
import jax.numpy as jnp
from jax.experimental import pallas as pl
from jax.experimental.pallas import tpu as pltpu

LENGTH = 6                      # module default
C_IN = 2
C_OUT = 16
KS = 3
L_OUT = LENGTH - KS + 1         # 4
FEAT = C_OUT * L_OUT            # 64
IN_FLAT = C_IN * LENGTH         # 12
HID = 128


def net_kernel(x_ref, w1t_ref, b1_ref, w2_ref, b2_ref, w3_ref, b3_ref, o_ref):
    # x_ref  : (12, bt)  bf16  batch on lanes; row index = c*LENGTH + l
    # w1t_ref: (128, 12) bf16  folded conv+flatten+fc1 weight, transposed
    # b1_ref : (128, 1)  f32
    # w2_ref : (128,128) bf16  fc2 weight in column form: h2_col = W2 @ h1_col
    # b2_ref : (128, 1)  f32
    # w3_ref : (128, 1)  f32   fc3 weight as a column (VPU/XLU path, not MXU)
    # b3_ref : (1, 1)    f32   SMEM scalar
    # o_ref  : (1, bt)   f32   lane-dense output row
    h1 = jnp.dot(w1t_ref[...], x_ref[...],
                 preferred_element_type=jnp.float32) + b1_ref[...]
    h1 = jnp.maximum(h1, 0.0)

    h2 = jnp.dot(w2_ref[...], h1.astype(jnp.bfloat16),
                 preferred_element_type=jnp.float32) + b2_ref[...]
    h2 = jnp.maximum(h2, 0.0)

    # fc3 (N=1 matmul) as a w3-weighted SUBLANE reduction: ~15 VPU adds plus a
    # few sublane-reduce steps per lane group, instead of a 1/128-utilized MXU
    # pass or the previous per-vreg cross-lane reduce.
    o_ref[...] = (jnp.sum(h2 * w3_ref[...], axis=0, keepdims=True)
                  + b3_ref[0, 0])


def _round_up(n, m):
    return ((n + m - 1) // m) * m


def _fold_conv_fc1(wc, bc, w1, b1):
    """Compose conv1d(2,16,3) -> flatten -> fc1 into one (12,128) affine map.

    Input flatten order is c*LENGTH + l (i.e. x_ncl.reshape(B, 12)); the
    conv-output flatten order o*L_OUT + t matches PyTorch's reshape.
    """
    eye = jnp.eye(IN_FLAT, dtype=jnp.float32).reshape(IN_FLAT, C_IN, LENGTH)
    patches = jnp.stack([eye[:, :, t:t + KS] for t in range(L_OUT)], axis=1)
    conv_lin = jnp.einsum("btck,ock->bot", patches, wc)          # (12, C_OUT, L_OUT)
    w_eff = conv_lin.reshape(IN_FLAT, FEAT) @ w1.T               # (12, HID)
    bias_feat = jnp.broadcast_to(bc[:, None], (C_OUT, L_OUT)).reshape(FEAT)
    b_eff = b1 + bias_feat @ w1.T                                # (HID,)
    return w_eff, b_eff


def net_forward(x_ncl, params, *, block_b=4096):
    """x_ncl: (B, 2, LENGTH) float32, NCL layout like the PyTorch module."""
    B = x_ncl.shape[0]
    wc, bc = params["conv_w"], params["conv_b"]
    w1, b1 = params["fc1_w"], params["fc1_b"]
    w2, b2 = params["fc2_w"], params["fc2_b"]
    w3, b3 = params["fc3_w"], params["fc3_b"]

    # --- parameter prep (tiny, plain JAX glue), column/transposed orientation ---
    w_eff, b_eff = _fold_conv_fc1(wc, bc, w1, b1)
    w1t_k = w_eff.T.astype(jnp.bfloat16)               # (128, 12)
    b1_k = b_eff.reshape(HID, 1).astype(jnp.float32)   # (128, 1)
    w2_k = w2.astype(jnp.bfloat16)                     # (128, 128): h2 = W2 @ h1
    b2_k = b2.reshape(HID, 1).astype(jnp.float32)      # (128, 1)
    w3_k = w3.reshape(HID, 1).astype(jnp.float32)      # fc3 weight as a column
    b3_k = b3.reshape(1, 1).astype(jnp.float32)        # scalar -> SMEM

    # --- batch tile: multiple of 256; >=2 grid steps when B > 256 (v7x TCs) ---
    block_b = _round_up(max(block_b, 256), 256)
    if B > 256:
        bt = min(block_b, _round_up(pl.cdiv(B, 2), 256))
    else:
        bt = 256
    pb = _round_up(B, bt)

    # --- input prep: flatten (c*LENGTH + l), put batch on the lane axis, bf16 ---
    x_t = x_ncl.reshape(B, IN_FLAT).T.astype(jnp.bfloat16)   # (12, B)
    if pb != B:
        x_t = jnp.pad(x_t, ((0, 0), (0, pb - B)))
    grid = (pb // bt,)

    const = lambda i: (0, 0)                           # weights resident across steps
    out_row = pl.pallas_call(
        net_kernel,
        out_shape=jax.ShapeDtypeStruct((1, pb), jnp.float32),
        grid=grid,
        in_specs=[
            pl.BlockSpec((IN_FLAT, bt), lambda i: (0, i)),       # x
            pl.BlockSpec((HID, IN_FLAT), const),                  # W1^T
            pl.BlockSpec((HID, 1), const),                        # b1
            pl.BlockSpec((HID, HID), const),                      # W2
            pl.BlockSpec((HID, 1), const),                        # b2
            pl.BlockSpec((HID, 1), const),                        # w3 column
            pl.BlockSpec(memory_space=pltpu.MemorySpace.SMEM),    # b3 scalar
        ],
        out_specs=pl.BlockSpec((1, bt), lambda i: (0, i)),        # lane-dense output
        compiler_params=pltpu.CompilerParams(
            dimension_semantics=("parallel",)),        # batch axis -> both v7x TCs
    )(x_t, w1t_k, b1_k, w2_k, b2_k, w3_k, b3_k)

    # Padded columns carry garbage (relu(bias) of zero inputs); this slice is
    # what keeps the result correct -- keep it if output is consumed downstream.
    return out_row[0, :B].reshape(B, 1)


def net_reference(x_ncl, params):
    """Pure-JAX f32 reference matching the PyTorch forward exactly."""
    B = x_ncl.shape[0]
    wc, bc = params["conv_w"], params["conv_b"]
    patches = jnp.stack([x_ncl[:, :, t:t + KS] for t in range(L_OUT)], axis=1)
    conv = jnp.einsum("btck,ock->bot", patches, wc) + bc[None, :, None]
    feat = conv.reshape(B, -1)
    h1 = jax.nn.relu(feat @ params["fc1_w"].T + params["fc1_b"])
    h2 = jax.nn.relu(h1 @ params["fc2_w"].T + params["fc2_b"])
    return h2 @ params["fc3_w"].T + params["fc3_b"]


def init_params(key):
    """Deterministic init with PyTorch-style uniform bounds."""
    ks = jax.random.split(key, 8)

    def unif(k, shape, fan_in):
        bound = 1.0 / jnp.sqrt(fan_in)
        return jax.random.uniform(k, shape, jnp.float32, -bound, bound)

    return {
        "conv_w": unif(ks[0], (C_OUT, C_IN, KS), C_IN * KS),
        "conv_b": unif(ks[1], (C_OUT,), C_IN * KS),
        "fc1_w": unif(ks[2], (HID, FEAT), FEAT),
        "fc1_b": unif(ks[3], (HID,), FEAT),
        "fc2_w": unif(ks[4], (HID, HID), HID),
        "fc2_b": unif(ks[5], (HID,), HID),
        "fc3_w": unif(ks[6], (1, HID), HID),
        "fc3_b": unif(ks[7], (1,), HID),
    }


if __name__ == "__main__":
    key = jax.random.PRNGKey(0)
    k_x, k_x2, k_p = jax.random.split(key, 3)
    params = init_params(k_p)

    # Small case (single grid step, batch padded to one 256-wide lane tile).
    B = 8
    x = jax.random.normal(k_x, (B, C_IN, LENGTH), jnp.float32)   # NCL layout
    out = jax.block_until_ready(net_forward(x, params))
    ref = net_reference(x, params)
    assert out.shape == (B, 1), out.shape
    assert jnp.allclose(out, ref, atol=5e-2, rtol=5e-2), (
        f"max abs diff {jnp.max(jnp.abs(out - ref))}")

    # Larger case: B=600 -> bt=512, 2 grid steps (exercises megacore split,
    # multi-step pipelining and batch padding).
    B2 = 600
    x2 = jax.random.normal(k_x2, (B2, C_IN, LENGTH), jnp.float32)
    out2 = jax.block_until_ready(net_forward(x2, params))
    ref2 = net_reference(x2, params)
    assert out2.shape == (B2, 1), out2.shape
    assert jnp.allclose(out2, ref2, atol=5e-2, rtol=5e-2), (
        f"max abs diff {jnp.max(jnp.abs(out2 - ref2))}")

    print("KERNEL_OK")
</pallas_src>

<mosaic_0001>
module attributes {stable_mosaic.version = 11 : i64} {
  func.func @net_kernel(%arg0: i32, %arg1: memref<12x256xbf16, #tpu.memory_space<vmem>>, %arg2: memref<128x12xbf16, #tpu.memory_space<vmem>>, %arg3: memref<128x1xf32, #tpu.memory_space<vmem>>, %arg4: memref<128x128xbf16, #tpu.memory_space<vmem>>, %arg5: memref<128x1xf32, #tpu.memory_space<vmem>>, %arg6: memref<128x1xf32, #tpu.memory_space<vmem>>, %arg7: memref<1x1xf32, #tpu.memory_space<smem>>, %arg8: memref<1x256xf32, #tpu.memory_space<vmem>>) attributes {dimension_semantics = [#tpu.dimension_semantics<parallel>], iteration_bounds = array<i64: 1>, scalar_prefetch = 0 : i64, scratch_operands = 0 : i64, tpu.core_type = #tpu.core_type<tc>, window_params = [{transform_indices = @transform_0, window_bounds = array<i64: 12, 256>}, {pipeline_mode = #tpu.pipeline_mode<synchronous>, transform_indices = @transform_1, window_bounds = array<i64: 128, 12>}, {pipeline_mode = #tpu.pipeline_mode<synchronous>, transform_indices = @transform_2, window_bounds = array<i64: 128, 1>}, {pipeline_mode = #tpu.pipeline_mode<synchronous>, transform_indices = @transform_3, window_bounds = array<i64: 128, 128>}, {pipeline_mode = #tpu.pipeline_mode<synchronous>, transform_indices = @transform_4, window_bounds = array<i64: 128, 1>}, {pipeline_mode = #tpu.pipeline_mode<synchronous>, transform_indices = @transform_5, window_bounds = array<i64: 128, 1>}, {transform_indices = @transform_6, window_bounds = array<i64: 1, 1>}, {transform_indices = @transform_7, window_bounds = array<i64: 1, 256>}]} {
    %c0 = arith.constant 0 : index
    %c0_0 = arith.constant 0 : index
    %0 = vector.load %arg2[%c0, %c0_0] : memref<128x12xbf16, #tpu.memory_space<vmem>>, vector<128x12xbf16>
    %c0_1 = arith.constant 0 : index
    %c0_2 = arith.constant 0 : index
    %1 = vector.load %arg1[%c0_1, %c0_2] : memref<12x256xbf16, #tpu.memory_space<vmem>>, vector<12x256xbf16>
    %cst = arith.constant dense<0.000000e+00> : vector<128x256xf32>
    %2 = tpu.matmul %0, %1, %cst {dimension_numbers = #tpu.dot_dimension_numbers<[1], [0], [0], [1], [0, 0, 1, 1], [], []>} : vector<128x12xbf16>, vector<12x256xbf16>, vector<128x256xf32> -> vector<128x256xf32>
    %c0_3 = arith.constant 0 : index
    %c0_4 = arith.constant 0 : index
    %3 = vector.load %arg3[%c0_3, %c0_4] : memref<128x1xf32, #tpu.memory_space<vmem>>, vector<128x1xf32>
    %4 = vector.broadcast %3 : vector<128x1xf32> to vector<128x256xf32>
    %5 = arith.addf %2, %4 : vector<128x256xf32>
    %cst_5 = arith.constant 0.000000e+00 : f32
    %6 = vector.broadcast %cst_5 : f32 to vector<128x256xf32>
    %7 = arith.maximumf %5, %6 : vector<128x256xf32>
    %c0_6 = arith.constant 0 : index
    %c0_7 = arith.constant 0 : index
    %8 = vector.load %arg4[%c0_6, %c0_7] : memref<128x128xbf16, #tpu.memory_space<vmem>>, vector<128x128xbf16>
    %9 = arith.truncf %7 : vector<128x256xf32> to vector<128x256xbf16>
    %cst_8 = arith.constant dense<0.000000e+00> : vector<128x256xf32>
    %10 = tpu.matmul %8, %9, %cst_8 {dimension_numbers = #tpu.dot_dimension_numbers<[1], [0], [0], [1], [0, 0, 1, 1], [], []>} : vector<128x128xbf16>, vector<128x256xbf16>, vector<128x256xf32> -> vector<128x256xf32>
    %c0_9 = arith.constant 0 : index
    %c0_10 = arith.constant 0 : index
    %11 = vector.load %arg5[%c0_9, %c0_10] : memref<128x1xf32, #tpu.memory_space<vmem>>, vector<128x1xf32>
    %12 = vector.broadcast %11 : vector<128x1xf32> to vector<128x256xf32>
    %13 = arith.addf %10, %12 : vector<128x256xf32>
    %cst_11 = arith.constant 0.000000e+00 : f32
    %14 = vector.broadcast %cst_11 : f32 to vector<128x256xf32>
    %15 = arith.maximumf %13, %14 : vector<128x256xf32>
    %c0_12 = arith.constant 0 : index
    %c0_13 = arith.constant 0 : index
    %16 = vector.load %arg6[%c0_12, %c0_13] : memref<128x1xf32, #tpu.memory_space<vmem>>, vector<128x1xf32>
    %17 = vector.broadcast %16 : vector<128x1xf32> to vector<128x256xf32>
    %18 = arith.mulf %15, %17 : vector<128x256xf32>
    %cst_14 = arith.constant dense<0.000000e+00> : vector<256xf32>
    %19 = vector.multi_reduction <add>, %18, %cst_14 [0] : vector<128x256xf32> to vector<256xf32>
    %20 = vector.shape_cast %19 : vector<256xf32> to vector<1x256xf32>
    %c0_15 = arith.constant 0 : index
    %c0_16 = arith.constant 0 : index
    %21 = memref.load %arg7[%c0_15, %c0_16] : memref<1x1xf32, #tpu.memory_space<smem>>
    %22 = vector.broadcast %21 : f32 to vector<1x256xf32>
    %23 = arith.addf %20, %22 : vector<1x256xf32>
    %c0_17 = arith.constant 0 : index
    %c0_18 = arith.constant 0 : index
    %24 = vector.load %arg8[%c0_17, %c0_18] : memref<1x256xf32, #tpu.memory_space<vmem>>, vector<1x256xf32>
    tpu.vector_store %arg8[%c0_17, %c0_18], %23 {strides = array<i32>} : memref<1x256xf32, #tpu.memory_space<vmem>>, vector<1x256xf32>,
    return
  }
  func.func @transform_0(%arg0: i32) -> (i32, i32) {
    %c0_i32 = arith.constant 0 : i32
    %c0_i32_0 = arith.constant 0 : i32
    return %c0_i32, %arg0 : i32, i32
  }
  func.func @transform_1(%arg0: i32) -> (i32, i32) {
    %c0_i32 = arith.constant 0 : i32
    %c0_i32_0 = arith.constant 0 : i32
    %c0_i32_1 = arith.constant 0 : i32
    return %c0_i32, %c0_i32_0 : i32, i32
  }
  func.func @transform_2(%arg0: i32) -> (i32, i32) {
    %c0_i32 = arith.constant 0 : i32
    %c0_i32_0 = arith.constant 0 : i32
    %c0_i32_1 = arith.constant 0 : i32
    return %c0_i32, %c0_i32_0 : i32, i32
  }
  func.func @transform_3(%arg0: i32) -> (i32, i32) {
    %c0_i32 = arith.constant 0 : i32
    %c0_i32_0 = arith.constant 0 : i32
    %c0_i32_1 = arith.constant 0 : i32
    return %c0_i32, %c0_i32_0 : i32, i32
  }
  func.func @transform_4(%arg0: i32) -> (i32, i32) {
    %c0_i32 = arith.constant 0 : i32
    %c0_i32_0 = arith.constant 0 : i32
    %c0_i32_1 = arith.constant 0 : i32
    return %c0_i32, %c0_i32_0 : i32, i32
  }
  func.func @transform_5(%arg0: i32) -> (i32, i32) {
    %c0_i32 = arith.constant 0 : i32
    %c0_i32_0 = arith.constant 0 : i32
    %c0_i32_1 = arith.constant 0 : i32
    return %c0_i32, %c0_i32_0 : i32, i32
  }
  func.func @transform_6(%arg0: i32) -> (i32, i32) {
    %c0_i32 = arith.constant 0 : i32
    %c0_i32_0 = arith.constant 0 : i32
    %c0_i32_1 = arith.constant 0 : i32
    return %c0_i32, %c0_i32_0 : i32, i32
  }
  func.func @transform_7(%arg0: i32) -> (i32, i32) {
    %c0_i32 = arith.constant 0 : i32
    %c0_i32_0 = arith.constant 0 : i32
    return %c0_i32, %arg0 : i32, i32
  }
}

</mosaic_0001>

<bundles_post_ra>
// kernel: tpu_custom_call.1
= control target key start
LH: loop header
LB: loop body
LE: loop exit
PB: predicated region body
PF: predicated region fallthrough
CT: control target
= control target key end

     0   :  { %vm216_vm0 = vcmask 1045504   ;;  %v991_v2 = vmov 0   ;;  %vm191_vm1 = vcmask 97280   ;;  %s1289_s0 = inlined_call_operand.vmem [shape: bf16[12,256], index: 0, kind: input, shape index: {}]   ;;  %s1290_s1 = inlined_call_operand.vmem [shape: bf16[128,12], index: 1, kind: input, shape index: {}]   ;;  %s1291_s2 = inlined_call_operand.vmem [shape: f32[128,1], index: 2, kind: input, shape index: {}]   ;;  %s1292_s3 = inlined_call_operand.vmem [shape: bf16[128,128], index: 3, kind: input, shape index: {}]   ;;  %s1293_s4 = inlined_call_operand.vmem [shape: f32[128,1], index: 4, kind: input, shape index: {}]   ;;  %s1294_s5 = inlined_call_operand.vmem [shape: f32[128,1], index: 5, kind: input, shape index: {}]   ;;  %s1295_s6 = inlined_call_operand.<no memory space> [shape: f32[1,1], index: 6, kind: input, shape index: {}]   ;;  %s1296_s7 = inlined_call_operand.hbm [shape: f32[1,256], index: 7, kind: output, shape index: {}]  }
   0x1   :  { %v948_v0 = vld [vmem:[%s1289_s0 + $0x4] ss:$8 sps:$4 sm:$0x3f]   ;;  %v950_v1 = vld [vmem:[%s1289_s0] ss:$8 sps:$4 sm:$0x3f]   ;;  %255 = vmatprep.mubr.bf16.mxu0 %v991_v2  ;;  %946 = vset.pattern.permute.xlu0 %v991_v2 }
   0x2   :  { %910 = vmatprep.subr.msk.bf16.mxu0 %vm216_vm0, %v948_v0  ;;  %v47_v3 = vld [vmem:[%s1291_s2] sm:$0xff]  ;;  %v218_v4 = vsel %vm216_vm0, %v950_v1, 0  ;;  %947 = vset.pattern.permute.xlu1 %v991_v2  ;;  %v49_v6 = vld [vmem:[%s1291_s2 + $0x10] sm:$0xff]  ;;  %v48_v7 = vld [vmem:[%s1291_s2 + $0x8] sm:$0xff] }
   0x3   :  { %v951_v5 = vld [vmem:[%s1290_s1] sm:$0xff]   ;;  %224 = vmatpush1.bf16.msra.mxu0 %v218_v4  ;;  %65 = vperm.xlu0 %946, %v47_v3   ;;  %v50_v8 = vld [vmem:[%s1291_s2 + $0x18] sm:$0xff]  ;;  %v52_v10 = vld [vmem:[%s1291_s2 + $0x28] sm:$0xff] }
   0x4   :  { %75 = vperm.xlu1 %947, %v49_v6   ;;  %586 = vmatprep.mubr.bf16.mxu1 %v991_v2  ;;  %v51_v9 = vld [vmem:[%s1291_s2 + $0x20] sm:$0xff]  ;;  %v952_v11 = vld [vmem:[%s1290_s1 + $0x8] sm:$0xff]   ;;  %v53_v12 = vld [vmem:[%s1291_s2 + $0x30] sm:$0xff] }
   0x5   :  { %v54_v13 = vld [vmem:[%s1291_s2 + $0x38] sm:$0xff]  ;;  %v55_v14 = vld [vmem:[%s1291_s2 + $0x40] sm:$0xff]  ;;  %v56_v15 = vld [vmem:[%s1291_s2 + $0x48] sm:$0xff] }
   0x6   :  { %911 = vmatmul.mubr.msk.bf16.vlgmr.msra.gmra.mrb[0].mxu0 %vm191_vm1, %v951_v5  ;;  %v953_v16 = vld [vmem:[%s1290_s1 + $0x10] sm:$0xff]   ;;  %v58_v18 = vld [vmem:[%s1291_s2 + $0x58] sm:$0xff]  ;;  %v59_v20 = vld [vmem:[%s1291_s2 + $0x60] sm:$0xff] }
   0x7   :  { %265 = vmatprep.mubr.bf16.mxu0 %v991_v2  ;;  %70 = vperm.xlu0 %946, %v48_v7   ;;  %v57_v17 = vld [vmem:[%s1291_s2 + $0x50] sm:$0xff]  ;;  %v954_v19 = vld [vmem:[%s1290_s1 + $0x18] sm:$0xff]   ;;  %v60_v21 = vld [vmem:[%s1291_s2 + $0x68] sm:$0xff] }
   0x8   :  { %80 = vperm.xlu1 %947, %v50_v8   ;;  %v61_v22 = vld [vmem:[%s1291_s2 + $0x70] sm:$0xff]  ;;  %v62_v23 = vld [vmem:[%s1291_s2 + $0x78] sm:$0xff] }
   0xb   :  { %85 = vperm.xlu0 %946, %v51_v9  }
   0xc   :  { %90 = vperm.xlu1 %947, %v52_v10  }
   0xe   :  { %912 = vmatmul.mubr.msk.bf16.gmra.mrb[4].mxu0 %vm191_vm1, %v952_v11 }
   0xf   :  { %275 = vmatprep.mubr.bf16.mxu0 %v991_v2  ;;  %95 = vperm.xlu0 %946, %v53_v12  }
  0x10   :  { %100 = vperm.xlu1 %947, %v54_v13  }
  0x13   :  { %105 = vperm.xlu0 %946, %v55_v14  }
  0x14   :  { %110 = vperm.xlu1 %947, %v56_v15  }
  0x16   :  { %913 = vmatmul.mubr.msk.bf16.gmra.mrb[8].mxu0 %vm191_vm1, %v953_v16 }
  0x17   :  { %285 = vmatprep.mubr.bf16.mxu0 %v991_v2  ;;  %115 = vperm.xlu0 %946, %v57_v17  }
  0x18   :  { %120 = vperm.xlu1 %947, %v58_v18  }
  0x1b   :  { %125 = vperm.xlu0 %946, %v59_v20  }
  0x1c   :  { %130 = vperm.xlu1 %947, %v60_v21  }
  0x1e   :  { %914 = vmatmul.mubr.msk.bf16.gmra.mrb[12].mxu0 %vm191_vm1, %v954_v19 }
  0x1f   :  { %13 = vsyncpa [#allocation4], 0  ;;  %295 = vmatprep.mubr.bf16.mxu0 %v991_v2  ;;  %135 = vperm.xlu0 %946, %v61_v22   ;;  %v400_v24 = vld [vmem:[%s1293_s4] sm:$0xff]  ;;  %v401_v25 = vld [vmem:[%s1293_s4 + $0x8] sm:$0xff]  ;;  %s993_s29 = smov [#allocation3]  }
  0x20   :  { %140 = vperm.xlu1 %947, %v62_v23   ;;  %v955_v26 = vld [vmem:[%s1290_s1 + $0x20] sm:$0xff]   ;;  %v402_v27 = vld [vmem:[%s1293_s4 + $0x10] sm:$0xff]  ;;  %v403_v28 = vld [vmem:[%s1293_s4 + $0x18] sm:$0xff]  ;;  %s892_s30 = sshll.u32 %s993_s29, 4  ;;  %s893_s30 = int_to_ptr.vmem [resolvable:$true] %s892_s30 }
  0x21   :  { %v689_v29 = vld [vmem:[%s1294_s5] sm:$0xff]  ;;  %v690_v30 = vld [vmem:[%s1294_s5 + $0x8] sm:$0xff]  ;;  %v691_v33 = vld [vmem:[%s1294_s5 + $0x10] sm:$0xff]  ;;  %s967_s8 = scalar_lea.vmem %s893_s30, 32  ;;  %p972_p1 = scmp.lt.s32.totalorder %s893_s30, %s893_s30 }
  0x22   :  { %v956_v31 = vld [vmem:[%s1290_s1 + $0x28] sm:$0xff]   ;;  %v404_v32 = vld [vmem:[%s1293_s4 + $0x20] sm:$0xff]  ;;  %v692_v35 = vld [vmem:[%s1294_s5 + $0x18] sm:$0xff]  ;;  %p968_p0 = scmp.ne.s32.totalorder %s893_s30, %s967_s8  ;;  %p973_p2 = scmp.lt.s32.totalorder %s967_s8, %s967_s8 }
  0x23   :  { %418 = vperm.xlu0 %946, %v400_v24   ;;  %v405_v34 = vld [vmem:[%s1293_s4 + $0x28] sm:$0xff]  ;;  %v957_v36 = vld [vmem:[%s1290_s1 + $0x30] sm:$0xff]   ;;  %v693_v38 = vld [vmem:[%s1294_s5 + $0x20] sm:$0xff] }
  0x24   :  { %423 = vperm.xlu1 %947, %v401_v25   ;;  %v406_v37 = vld [vmem:[%s1293_s4 + $0x30] sm:$0xff]  ;;  %v407_v39 = vld [vmem:[%s1293_s4 + $0x38] sm:$0xff]  ;;  %v694_v40 = vld [vmem:[%s1294_s5 + $0x28] sm:$0xff]  ;;  %p974_p3 = por %p973_p2, %p972_p1 }
  0x25   :  { %v958_v41 = vld [vmem:[%s1290_s1 + $0x38] sm:$0xff]   ;;  %v408_v42 = vld [vmem:[%s1293_s4 + $0x40] sm:$0xff]  ;;  %v695_v43 = vld [vmem:[%s1294_s5 + $0x30] sm:$0xff] }
  0x26   :  { %915 = vmatmul.mubr.msk.bf16.gmra.mrb[16].mxu0 %vm191_vm1, %v955_v26  ;;  %v409_v44 = vld [vmem:[%s1293_s4 + $0x48] sm:$0xff]  ;;  %v696_v45 = vld [vmem:[%s1294_s5 + $0x38] sm:$0xff]  ;;  %v410_v46 = vld [vmem:[%s1293_s4 + $0x50] sm:$0xff]  ;;  %p975_p4 = pnand %p974_p3, %p968_p0 }
  0x27   :  { %305 = vmatprep.mubr.bf16.mxu0 %v991_v2  ;;  %428 = vperm.xlu0 %946, %v402_v27   ;;  %v697_v47 = vld [vmem:[%s1294_s5 + $0x40] sm:$0xff]  ;;  %v411_v48 = vld [vmem:[%s1293_s4 + $0x58] sm:$0xff]  ;;  %v698_v49 = vld [vmem:[%s1294_s5 + $0x48] sm:$0xff] }
  0x28   :  { %433 = vperm.xlu1 %947, %v403_v28   ;;  %v412_v50 = vld [vmem:[%s1293_s4 + $0x60] sm:$0xff]  ;;  %v699_v51 = vld [vmem:[%s1294_s5 + $0x50] sm:$0xff]  ;;  %v413_v52 = vld [vmem:[%s1293_s4 + $0x68] sm:$0xff] }
  0x29   :  { %v700_v53 = vld [vmem:[%s1294_s5 + $0x58] sm:$0xff]  ;;  %v414_v54 = vld [vmem:[%s1293_s4 + $0x70] sm:$0xff]  ;;  %v701_v55 = vld [vmem:[%s1294_s5 + $0x60] sm:$0xff] }
  0x2a   :  { %v415_v56 = vld [vmem:[%s1293_s4 + $0x78] sm:$0xff]  ;;  %v702_v57 = vld [vmem:[%s1294_s5 + $0x68] sm:$0xff]  ;;  %v703_v58 = vld [vmem:[%s1294_s5 + $0x70] sm:$0xff] }
  0x2b   :  { %707 = vperm.xlu0 %946, %v689_v29   ;;  %v704_v59 = vld [vmem:[%s1294_s5 + $0x78] sm:$0xff] }
  0x2c   :  { %712 = vperm.xlu1 %947, %v690_v30  }
  0x2e   :  { %916 = vmatmul.mubr.msk.bf16.gmra.mrb[20].mxu0 %vm191_vm1, %v956_v31 }
  0x2f   :  { %315 = vmatprep.mubr.bf16.mxu0 %v991_v2  ;;  %438 = vperm.xlu0 %946, %v404_v32  }
  0x30   :  { %717 = vperm.xlu1 %947, %v691_v33  }
  0x33   :  { %443 = vperm.xlu0 %946, %v405_v34  }
  0x34   :  { %722 = vperm.xlu1 %947, %v692_v35  }
  0x36   :  { %917 = vmatmul.mubr.msk.bf16.gmra.mrb[24].mxu0 %vm191_vm1, %v957_v36 }
  0x37   :  { %325 = vmatprep.mubr.bf16.mxu0 %v991_v2  ;;  %448 = vperm.xlu0 %946, %v406_v37  }
  0x38   :  { %727 = vperm.xlu1 %947, %v693_v38  }
  0x3b   :  { %453 = vperm.xlu0 %946, %v407_v39  }
  0x3c   :  { %732 = vperm.xlu1 %947, %v694_v40  }
  0x3e   :  { %918 = vmatmul.mubr.msk.bf16.gmra.mrb[28].mxu0 %vm191_vm1, %v958_v41 }
  0x3f   :  { %458 = vperm.xlu0 %946, %v408_v42   ;;  %576 = vmatprep.mubr.bf16.mxu0 %v991_v2 }
  0x40   :  { %737 = vperm.xlu1 %947, %v695_v43  }
  0x43   :  { %463 = vperm.xlu0 %946, %v409_v44  }
  0x44   :  { %742 = vperm.xlu1 %947, %v696_v45  }
  0x47   :  { %468 = vperm.xlu0 %946, %v410_v46  }
  0x48   :  { %747 = vperm.xlu1 %947, %v697_v47  }
  0x4b   :  { %473 = vperm.xlu0 %946, %v411_v48  }
  0x4c   :  { %752 = vperm.xlu1 %947, %v698_v49  }
  0x4f   :  { %478 = vperm.xlu0 %946, %v412_v50  }
  0x50   :  { %757 = vperm.xlu1 %947, %v699_v51  }
  0x53   :  { %483 = vperm.xlu0 %946, %v413_v52  }
  0x54   :  { %762 = vperm.xlu1 %947, %v700_v53  }
  0x57   :  { %488 = vperm.xlu0 %946, %v414_v54  }
  0x58   :  { %767 = vperm.xlu1 %947, %v701_v55  }
  0x5b   :  { %493 = vperm.xlu0 %946, %v415_v56  }
  0x5c   :  { %772 = vperm.xlu1 %947, %v702_v57  }
  0x5f   :  { %777 = vperm.xlu0 %946, %v703_v58  }
  0x60   :  { %782 = vperm.xlu1 %947, %v704_v59  }
  0x82   :  { %v66_v60 = vpop.permute.xlu0 %65 }
  0x83   :  { %v76_v6 = vpop.permute.xlu1 %75 }
  0x86   :  { %v71_v0 = vpop.permute.xlu0 %70 }
  0x87   :  { %v81_v17 = vpop.permute.xlu1 %80 }
  0x8a   :  { %v86_v28 = vpop.permute.xlu0 %85 }
  0x8b   :  { %v91_v33 = vpop.permute.xlu1 %90 }
  0x8e   :  { %v96_v44 = vpop.permute.xlu0 %95 }
  0x8f   :  { %v101_v49 = vpop.permute.xlu1 %100 }
  0xd9   :  { %v257_v61 = vpop.f32.mrb[0].mxu0 }
  0xda   :  { %v258_v62 = vadd.f32 %v257_v61, %v66_v60  ;;  %v259_v63 = vpop.f32.mrb[1].mxu0 }
  0xdb   :  { %v260_v1 = vadd.f32 %v259_v63, %v66_v60  ;;  %v261_v3 = vpop.f32.mrb[2].mxu0  ;;  %v106_v60 = vpop.permute.xlu0 %105 }
  0xdc   :  { %v262_v4 = vadd.f32 %v261_v3, %v71_v0  ;;  %v263_v5 = vpop.f32.mrb[3].mxu0  ;;  %v336_v8 = vmax.f32 %v258_v62, 0.0 }
  0xdd   :  { %v264_v7 = vadd.f32 %v263_v5, %v71_v0  ;;  %v337_v10 = vmax.f32 %v260_v1, 0.0  ;;  %v111_v1 = vpop.permute.xlu1 %110 }
  0xde   :  { %v338_v9 = vmax.f32 %v262_v4, 0.0 }
  0xdf   :  { %v339_v11 = vmax.f32 %v264_v7, 0.0 }
  0xe0   :  { %v384_v12 = vpack.c.bf16 %v338_v9, %v336_v8 }
  0xe1   :  { %v385_v13 = vpack.c.bf16 %v339_v11, %v337_v10  ;;  %v267_v14 = vpop.f32.mrb[4].mxu0 }
  0xe2   :  { %v268_v15 = vadd.f32 %v267_v14, %v76_v6  ;;  %v269_v16 = vpop.f32.mrb[5].mxu0 }
  0xe3   :  { %v270_v18 = vadd.f32 %v269_v16, %v76_v6  ;;  %v271_v19 = vpop.f32.mrb[6].mxu0  ;;  %544 = vmatprep.subr.bf16.mxu0 %v385_v13  ;;  %927 = vmatprep.subr.bf16.mxu1 %v385_v13  ;;  %v116_v13 = vpop.permute.xlu0 %115 }
  0xe4   :  { %v272_v20 = vadd.f32 %v271_v19, %v81_v17  ;;  %v273_v21 = vpop.f32.mrb[7].mxu0  ;;  %545 = vmatpush1.bf16.msra.mxu0 %v384_v12  ;;  %935 = vmatpush1.bf16.msra.mxu1 %v384_v12  ;;  %v340_v23 = vmax.f32 %v268_v15, 0.0 }
  0xe5   :  { %v274_v22 = vadd.f32 %v273_v21, %v81_v17  ;;  %v341_v25 = vmax.f32 %v270_v18, 0.0  ;;  %v121_v18 = vpop.permute.xlu1 %120 }
  0xe6   :  { %v342_v24 = vmax.f32 %v272_v20, 0.0 }
  0xe7   :  { %v343_v26 = vmax.f32 %v274_v22, 0.0 }
  0xe8   :  { %v386_v27 = vpack.c.bf16 %v342_v24, %v340_v23 }
  0xe9   :  { %v387_v29 = vpack.c.bf16 %v343_v26, %v341_v25  ;;  %v277_v30 = vpop.f32.mrb[8].mxu0 }
  0xea   :  { %v278_v31 = vadd.f32 %v277_v30, %v86_v28  ;;  %v279_v32 = vpop.f32.mrb[9].mxu0 }
  0xeb   :  { %v280_v34 = vadd.f32 %v279_v32, %v86_v28  ;;  %v281_v35 = vpop.f32.mrb[10].mxu0  ;;  %546 = vmatprep.subr.bf16.mxu0 %v387_v29  ;;  %928 = vmatprep.subr.bf16.mxu1 %v387_v29  ;;  %v126_v29 = vpop.permute.xlu0 %125 }
  0xec   :  { %v282_v36 = vadd.f32 %v281_v35, %v91_v33  ;;  %v283_v37 = vpop.f32.mrb[11].mxu0  ;;  %547 = vmatpush1.bf16.msra.mxu0 %v386_v27  ;;  %936 = vmatpush1.bf16.msra.mxu1 %v386_v27  ;;  %v344_v39 = vmax.f32 %v278_v31, 0.0 }
  0xed   :  { %v284_v38 = vadd.f32 %v283_v37, %v91_v33  ;;  %v345_v41 = vmax.f32 %v280_v34, 0.0  ;;  %v131_v34 = vpop.permute.xlu1 %130 }
  0xee   :  { %v346_v40 = vmax.f32 %v282_v36, 0.0 }
  0xef   :  { %v347_v42 = vmax.f32 %v284_v38, 0.0 }
  0xf0   :  { %v388_v43 = vpack.c.bf16 %v346_v40, %v344_v39 }
  0xf1   :  { %v389_v45 = vpack.c.bf16 %v347_v42, %v345_v41  ;;  %v287_v46 = vpop.f32.mrb[12].mxu0 }
  0xf2   :  { %v288_v47 = vadd.f32 %v287_v46, %v96_v44  ;;  %v289_v48 = vpop.f32.mrb[13].mxu0 }
  0xf3   :  { %v290_v50 = vadd.f32 %v289_v48, %v96_v44  ;;  %v291_v51 = vpop.f32.mrb[14].mxu0  ;;  %548 = vmatprep.subr.bf16.mxu0 %v389_v45  ;;  %929 = vmatprep.subr.bf16.mxu1 %v389_v45  ;;  %v136_v45 = vpop.permute.xlu0 %135 }
  0xf4   :  { %v292_v52 = vadd.f32 %v291_v51, %v101_v49  ;;  %v293_v53 = vpop.f32.mrb[15].mxu0  ;;  %549 = vmatpush1.bf16.msra.mxu0 %v388_v43  ;;  %937 = vmatpush1.bf16.msra.mxu1 %v388_v43  ;;  %v348_v55 = vmax.f32 %v288_v47, 0.0 }
  0xf5   :  { %v294_v54 = vadd.f32 %v293_v53, %v101_v49  ;;  %v349_v57 = vmax.f32 %v290_v50, 0.0  ;;  %v141_v50 = vpop.permute.xlu1 %140 }
  0xf6   :  { %v350_v56 = vmax.f32 %v292_v52, 0.0 }
  0xf7   :  { %v351_v58 = vmax.f32 %v294_v54, 0.0 }
  0xf8   :  { %v390_v59 = vpack.c.bf16 %v350_v56, %v348_v55 }
  0xf9   :  { %v391_v61 = vpack.c.bf16 %v351_v58, %v349_v57  ;;  %v297_v62 = vpop.f32.mrb[16].mxu0 }
  0xfa   :  { %v298_v63 = vadd.f32 %v297_v62, %v106_v60  ;;  %v299_v0 = vpop.f32.mrb[17].mxu0  ;;  %v959_v62 = vld [vmem:[%s1292_s3] sm:$0xff]  }
  0xfb   :  { %v300_v3 = vadd.f32 %v299_v0, %v106_v60  ;;  %v301_v4 = vpop.f32.mrb[18].mxu0  ;;  %550 = vmatprep.subr.bf16.mxu0 %v391_v61  ;;  %930 = vmatprep.subr.bf16.mxu1 %v391_v61  ;;  %v961_v0 = vld [vmem:[%s1292_s3 + $0x10] sm:$0xff]  }
  0xfc   :  { %v302_v5 = vadd.f32 %v301_v4, %v111_v1  ;;  %v303_v6 = vpop.f32.mrb[19].mxu0  ;;  %551 = vmatpush1.bf16.msra.mxu0 %v390_v59  ;;  %938 = vmatpush1.bf16.msra.mxu1 %v390_v59  ;;  %v352_v8 = vmax.f32 %v298_v63, 0.0  ;;  %v960_v63 = vld [vmem:[%s1292_s3 + $0x8] sm:$0xff]  }
  0xfd   :  { %v304_v7 = vadd.f32 %v303_v6, %v111_v1  ;;  %v353_v10 = vmax.f32 %v300_v3, 0.0  ;;  %v962_v1 = vld [vmem:[%s1292_s3 + $0x18] sm:$0xff]   ;;  %v963_v3 = vld [vmem:[%s1292_s3 + $0x20] sm:$0xff]   ;;  %v964_v4 = vld [vmem:[%s1292_s3 + $0x28] sm:$0xff]  }
  0xfe   :  { %v354_v9 = vmax.f32 %v302_v5, 0.0  ;;  %v965_v5 = vld [vmem:[%s1292_s3 + $0x30] sm:$0xff]   ;;  %v966_v6 = vld [vmem:[%s1292_s3 + $0x38] sm:$0xff]  }
  0xff   :  { %v355_v11 = vmax.f32 %v304_v7, 0.0  ;;  %v419_v7 = vpop.permute.xlu0 %418 }
 0x100   :  { %v392_v12 = vpack.c.bf16 %v354_v9, %v352_v8  ;;  %v424_v8 = vpop.permute.xlu1 %423 }
 0x101   :  { %v393_v14 = vpack.c.bf16 %v355_v11, %v353_v10  ;;  %v307_v15 = vpop.f32.mrb[20].mxu0 }
 0x102   :  { %v308_v16 = vadd.f32 %v307_v15, %v116_v13  ;;  %v309_v17 = vpop.f32.mrb[21].mxu0 }
 0x103   :  { %v310_v19 = vadd.f32 %v309_v17, %v116_v13  ;;  %v311_v20 = vpop.f32.mrb[22].mxu0  ;;  %552 = vmatprep.subr.bf16.mxu0 %v393_v14  ;;  %931 = vmatprep.subr.bf16.mxu1 %v393_v14  ;;  %v429_v9 = vpop.permute.xlu0 %428 }
 0x104   :  { %v312_v21 = vadd.f32 %v311_v20, %v121_v18  ;;  %v313_v22 = vpop.f32.mrb[23].mxu0  ;;  %553 = vmatpush1.bf16.msra.mxu0 %v392_v12  ;;  %939 = vmatpush1.bf16.msra.mxu1 %v392_v12  ;;  %v356_v24 = vmax.f32 %v308_v16, 0.0  ;;  %v434_v10 = vpop.permute.xlu1 %433 }
 0x105   :  { %v314_v23 = vadd.f32 %v313_v22, %v121_v18  ;;  %v357_v26 = vmax.f32 %v310_v19, 0.0 }
 0x106   :  { %v358_v25 = vmax.f32 %v312_v21, 0.0 }
 0x107   :  { %v359_v27 = vmax.f32 %v314_v23, 0.0  ;;  %v708_v11 = vpop.permute.xlu0 %707 }
 0x108   :  { %v394_v28 = vpack.c.bf16 %v358_v25, %v356_v24  ;;  %v713_v12 = vpop.permute.xlu1 %712 }
 0x109   :  { %v395_v30 = vpack.c.bf16 %v359_v27, %v357_v26  ;;  %v317_v31 = vpop.f32.mrb[24].mxu0 }
 0x10a   :  { %v318_v32 = vadd.f32 %v317_v31, %v126_v29  ;;  %v319_v33 = vpop.f32.mrb[25].mxu0 }
 0x10b   :  { %v320_v35 = vadd.f32 %v319_v33, %v126_v29  ;;  %v321_v36 = vpop.f32.mrb[26].mxu0  ;;  %554 = vmatprep.subr.bf16.mxu0 %v395_v30  ;;  %932 = vmatprep.subr.bf16.mxu1 %v395_v30  ;;  %v439_v13 = vpop.permute.xlu0 %438 }
 0x10c   :  { %v322_v37 = vadd.f32 %v321_v36, %v131_v34  ;;  %v323_v38 = vpop.f32.mrb[27].mxu0  ;;  %555 = vmatpush1.bf16.msra.mxu0 %v394_v28  ;;  %940 = vmatpush1.bf16.msra.mxu1 %v394_v28  ;;  %v360_v40 = vmax.f32 %v318_v32, 0.0  ;;  %v718_v14 = vpop.permute.xlu1 %717 }
 0x10d   :  { %v324_v39 = vadd.f32 %v323_v38, %v131_v34  ;;  %v361_v42 = vmax.f32 %v320_v35, 0.0 }
 0x10e   :  { %v362_v41 = vmax.f32 %v322_v37, 0.0 }
 0x10f   :  { %v363_v43 = vmax.f32 %v324_v39, 0.0  ;;  %v444_v15 = vpop.permute.xlu0 %443 }
 0x110   :  { %v396_v44 = vpack.c.bf16 %v362_v41, %v360_v40  ;;  %v723_v16 = vpop.permute.xlu1 %722 }
 0x111   :  { %v397_v46 = vpack.c.bf16 %v363_v43, %v361_v42  ;;  %v327_v47 = vpop.f32.mrb[28].mxu0 }
 0x112   :  { %v328_v48 = vadd.f32 %v327_v47, %v136_v45  ;;  %v329_v49 = vpop.f32.mrb[29].mxu0 }
 0x113   :  { %v330_v51 = vadd.f32 %v329_v49, %v136_v45  ;;  %v331_v52 = vpop.f32.mrb[30].mxu0  ;;  %556 = vmatprep.subr.bf16.mxu0 %v397_v46  ;;  %933 = vmatprep.subr.bf16.mxu1 %v397_v46  ;;  %v1258_v17 = vpop.permute.xlu0 %448 }
 0x114   :  { %v332_v53 = vadd.f32 %v331_v52, %v141_v50  ;;  %v333_v54 = vpop.f32.mrb[31].mxu0  ;;  %557 = vmatpush1.bf16.msra.mxu0 %v396_v44  ;;  %941 = vmatpush1.bf16.msra.mxu1 %v396_v44  ;;  %v364_v56 = vmax.f32 %v328_v48, 0.0  ;;  %v728_v18 = vpop.permute.xlu1 %727 }
 0x115   :  { %v334_v55 = vadd.f32 %v333_v54, %v141_v50  ;;  %v365_v58 = vmax.f32 %v330_v51, 0.0 }
 0x116   :  { %v366_v57 = vmax.f32 %v332_v53, 0.0 }
 0x117   :  { %v367_v59 = vmax.f32 %v334_v55, 0.0  ;;  %v1260_v19 = vpop.permute.xlu0 %453 }
 0x118   :  { %v398_v60 = vpack.c.bf16 %v366_v57, %v364_v56 }
 0x119   :  { %v399_v61 = vpack.c.bf16 %v367_v59, %v365_v58 }
 0x11b   :  { %558 = vmatprep.subr.bf16.mxu0 %v399_v61  ;;  %934 = vmatprep.subr.bf16.mxu1 %v399_v61  ;;  %v1262_v20 = vpop.permute.xlu0 %458 }
 0x11c   :  { %559 = vmatpush1.bf16.msra.mxu0 %v398_v60  ;;  %942 = vmatpush1.bf16.msra.mxu1 %v398_v60 }
 0x11f   :  { %577 = vmatmul.mubr.bf16.vlgmr.msra.gmra.mrb[32].mxu0 %v959_v62  ;;  %587 = vmatmul.mubr.bf16.vlgmr.msra.gmra.mrb[0].mxu1 %v960_v63  ;;  %v1264_v51 = vpop.permute.xlu0 %463 }
 0x120   :  { %596 = vmatprep.mubr.bf16.mxu1 %v991_v2 }
 0x127   :  { %597 = vmatmul.mubr.bf16.gmra.mrb[4].mxu1 %v961_v0 }
 0x128   :  { %606 = vmatprep.mubr.bf16.mxu1 %v991_v2 }
 0x12f   :  { %607 = vmatmul.mubr.bf16.gmra.mrb[8].mxu1 %v962_v1 }
 0x130   :  { %616 = vmatprep.mubr.bf16.mxu1 %v991_v2 }
 0x137   :  { %617 = vmatmul.mubr.bf16.gmra.mrb[12].mxu1 %v963_v3 }
 0x138   :  { %626 = vmatprep.mubr.bf16.mxu1 %v991_v2 }
 0x13f   :  { %627 = vmatmul.mubr.bf16.gmra.mrb[16].mxu1 %v964_v4 }
 0x140   :  { %636 = vmatprep.mubr.bf16.mxu1 %v991_v2 }
 0x147   :  { %637 = vmatmul.mubr.bf16.gmra.mrb[20].mxu1 %v965_v5 }
 0x148   :  { %646 = vmatprep.mubr.bf16.mxu1 %v991_v2  ;;  %v733_v2 = vpop.permute.xlu1 %732 }
 0x14c   :  { %v738_v36 = vpop.permute.xlu1 %737 }
 0x14f   :  { %647 = vmatmul.mubr.bf16.gmra.mrb[24].mxu1 %v966_v6 }
 0x150   :  { %v743_v56 = vpop.permute.xlu1 %742 }
 0x1f2   :  { %v578_v21 = vpop.f32.mrb[32].mxu0  ;;  %v588_v22 = vpop.f32.mrb[0].mxu1 }
 0x1f3   :  { %v579_v23 = vadd.f32 %v578_v21, %v419_v7  ;;  %v589_v24 = vadd.f32 %v588_v22, %v429_v9  ;;  %v580_v25 = vpop.f32.mrb[33].mxu0  ;;  %v590_v26 = vpop.f32.mrb[1].mxu1 }
 0x1f4   :  { %v581_v27 = vadd.f32 %v580_v25, %v419_v7  ;;  %v591_v28 = vadd.f32 %v590_v26, %v429_v9  ;;  %v582_v29 = vpop.f32.mrb[34].mxu0  ;;  %v592_v30 = vpop.f32.mrb[2].mxu1 }
 0x1f5   :  { %v657_v31 = vmax.f32 %v579_v23, 0.0  ;;  %v583_v32 = vadd.f32 %v582_v29, %v424_v8  ;;  %v593_v33 = vadd.f32 %v592_v30, %v434_v10  ;;  %v584_v34 = vpop.f32.mrb[35].mxu0  ;;  %v594_v35 = vpop.f32.mrb[3].mxu1  ;;  %v661_v40 = vmax.f32 %v589_v24, 0.0 }
 0x1f6   :  { %v658_v37 = vmax.f32 %v581_v27, 0.0  ;;  %v585_v38 = vadd.f32 %v584_v34, %v424_v8  ;;  %v595_v39 = vadd.f32 %v594_v35, %v434_v10  ;;  %v662_v42 = vmax.f32 %v591_v28, 0.0  ;;  %v469_v21 = vpop.permute.xlu0 %468 }
 0x1f7   :  { %v659_v41 = vmax.f32 %v583_v32, 0.0  ;;  %v785_v44 = vmul.f32 %v708_v11, %v657_v31  ;;  %v663_v46 = vmax.f32 %v593_v33, 0.0  ;;  %v789_v52 = vmul.f32 %v718_v14, %v661_v40 }
 0x1f8   :  { %v660_v43 = vmax.f32 %v585_v38, 0.0  ;;  %v786_v47 = vmul.f32 %v708_v11, %v658_v37  ;;  %v664_v49 = vmax.f32 %v595_v39, 0.0  ;;  %v790_v57 = vmul.f32 %v718_v14, %v662_v42 }
 0x1f9   :  { %v787_v45 = vmul.f32 %v713_v12, %v659_v41  ;;  %v791_v61 = vmul.f32 %v723_v16, %v663_v46 }
 0x1fa   :  { %v788_v48 = vmul.f32 %v713_v12, %v660_v43  ;;  %v598_v50 = vpop.f32.mrb[4].mxu1  ;;  %v792_v3 = vmul.f32 %v723_v16, %v664_v49  ;;  %v474_v34 = vpop.permute.xlu0 %473 }
 0x1fb   :  { %v817_v53 = vadd.f32 %v787_v45, %v785_v44  ;;  %v599_v54 = vadd.f32 %v598_v50, %v439_v13  ;;  %v600_v55 = vpop.f32.mrb[5].mxu1 }
 0x1fc   :  { %v838_v58 = vadd.f32 %v788_v48, %v786_v47  ;;  %v601_v59 = vadd.f32 %v600_v55, %v439_v13  ;;  %v602_v60 = vpop.f32.mrb[6].mxu1  ;;  %v748_v13 = vpop.permute.xlu1 %747 }
 0x1fd   :  { %v818_v62 = vadd.f32 %v817_v53, %v789_v52  ;;  %v665_v63 = vmax.f32 %v599_v54, 0.0  ;;  %v603_v0 = vadd.f32 %v602_v60, %v444_v15  ;;  %v604_v1 = vpop.f32.mrb[7].mxu1 }
 0x1fe   :  { %v839_v4 = vadd.f32 %v838_v58, %v790_v57  ;;  %v666_v5 = vmax.f32 %v601_v59, 0.0  ;;  %v605_v6 = vadd.f32 %v604_v1, %v444_v15 }
 0x1ff   :  { %v819_v7 = vadd.f32 %v818_v62, %v791_v61  ;;  %v793_v8 = vmul.f32 %v728_v18, %v665_v63  ;;  %v667_v9 = vmax.f32 %v603_v0, 0.0 }
 0x200   :  { %v840_v10 = vadd.f32 %v839_v4, %v792_v3  ;;  %v794_v11 = vmul.f32 %v728_v18, %v666_v5  ;;  %v668_v12 = vmax.f32 %v605_v6, 0.0 }
 0x201   :  { %v820_v14 = vadd.f32 %v819_v7, %v793_v8  ;;  %v795_v22 = vmul.f32 %v733_v2, %v667_v9 }
 0x202   :  { %v841_v23 = vadd.f32 %v840_v10, %v794_v11  ;;  %v796_v24 = vmul.f32 %v733_v2, %v668_v12  ;;  %v608_v25 = vpop.f32.mrb[8].mxu1  ;;  %v753_v2 = vpop.permute.xlu1 %752 }
 0x203   :  { %v821_v26 = vadd.f32 %v820_v14, %v795_v22  ;;  %v609_v27 = vadd.f32 %v608_v25, %v1258_v17  ;;  %v610_v16 = vpop.f32.mrb[9].mxu1 }
 0x204   :  { %v842_v28 = vadd.f32 %v841_v23, %v796_v24  ;;  %v611_v15 = vadd.f32 %v610_v16, %v1258_v17  ;;  %v612_v29 = vpop.f32.mrb[10].mxu1 }
 0x205   :  { %v669_v30 = vmax.f32 %v609_v27, 0.0  ;;  %v613_v31 = vadd.f32 %v612_v29, %v1260_v19  ;;  %v614_v18 = vpop.f32.mrb[11].mxu1 }
 0x206   :  { %v670_v32 = vmax.f32 %v611_v15, 0.0  ;;  %v615_v33 = vadd.f32 %v614_v18, %v1260_v19  ;;  %v479_v19 = vpop.permute.xlu0 %478 }
 0x207   :  { %v797_v35 = vmul.f32 %v738_v36, %v669_v30  ;;  %v671_v37 = vmax.f32 %v613_v31, 0.0 }
 0x208   :  { %v798_v38 = vmul.f32 %v738_v36, %v670_v32  ;;  %v672_v39 = vmax.f32 %v615_v33, 0.0  ;;  %v758_v36 = vpop.permute.xlu1 %757 }
 0x209   :  { %v822_v40 = vadd.f32 %v821_v26, %v797_v35  ;;  %v799_v41 = vmul.f32 %v743_v56, %v671_v37 }
 0x20a   :  { %v843_v42 = vadd.f32 %v842_v28, %v798_v38  ;;  %v800_v43 = vmul.f32 %v743_v56, %v672_v39  ;;  %v618_v44 = vpop.f32.mrb[12].mxu1 }
 0x20b   :  { %v823_v17 = vadd.f32 %v822_v40, %v799_v41  ;;  %v619_v45 = vadd.f32 %v618_v44, %v1262_v20  ;;  %v620_v46 = vpop.f32.mrb[13].mxu1 }
 0x20c   :  { %v844_v47 = vadd.f32 %v843_v42, %v800_v43  ;;  %v621_v48 = vadd.f32 %v620_v46, %v1262_v20  ;;  %v622_v49 = vpop.f32.mrb[14].mxu1  ;;  %v484_v20 = vpop.permute.xlu0 %483 }
 0x20d   :  { %v673_v50 = vmax.f32 %v619_v45, 0.0  ;;  %v623_v52 = vadd.f32 %v622_v49, %v1264_v51  ;;  %v624_v53 = vpop.f32.mrb[15].mxu1  ;;  %v763_v5 = vpop.permute.xlu1 %762 }
 0x20e   :  { %v674_v54 = vmax.f32 %v621_v48, 0.0  ;;  %v625_v55 = vadd.f32 %v624_v53, %v1264_v51 }
 0x20f   :  { %v801_v57 = vmul.f32 %v748_v13, %v673_v50  ;;  %v675_v56 = vmax.f32 %v623_v52, 0.0 }
 0x210   :  { %v802_v58 = vmul.f32 %v748_v13, %v674_v54  ;;  %v676_v59 = vmax.f32 %v625_v55, 0.0  ;;  %v489_v24 = vpop.permute.xlu0 %488 }
 0x211   :  { %v824_v60 = vadd.f32 %v823_v17, %v801_v57  ;;  %v803_v61 = vmul.f32 %v753_v2, %v675_v56  ;;  %v768_v27 = vpop.permute.xlu1 %767 }
 0x212   :  { %v845_v62 = vadd.f32 %v844_v47, %v802_v58  ;;  %v804_v63 = vmul.f32 %v753_v2, %v676_v59  ;;  %v628_v0 = vpop.f32.mrb[16].mxu1 }
 0x213   :  { %v825_v1 = vadd.f32 %v824_v60, %v803_v61  ;;  %v629_v3 = vadd.f32 %v628_v0, %v469_v21  ;;  %v630_v4 = vpop.f32.mrb[17].mxu1 }
 0x214   :  { %v846_v6 = vadd.f32 %v845_v62, %v804_v63  ;;  %v631_v7 = vadd.f32 %v630_v4, %v469_v21  ;;  %v632_v8 = vpop.f32.mrb[18].mxu1  ;;  %v494_v40 = vpop.permute.xlu0 %493 }
 0x215   :  { %v677_v9 = vmax.f32 %v629_v3, 0.0  ;;  %v633_v10 = vadd.f32 %v632_v8, %v474_v34  ;;  %v634_v51 = vpop.f32.mrb[19].mxu1  ;;  %v773_v41 = vpop.permute.xlu1 %772 }
 0x216   :  { %v678_v11 = vmax.f32 %v631_v7, 0.0  ;;  %v635_v12 = vadd.f32 %v634_v51, %v474_v34 }
 0x217   :  { %v805_v14 = vmul.f32 %v758_v36, %v677_v9  ;;  %v679_v22 = vmax.f32 %v633_v10, 0.0 }
 0x218   :  { %v806_v13 = vmul.f32 %v758_v36, %v678_v11  ;;  %v680_v23 = vmax.f32 %v635_v12, 0.0  ;;  %v778_v57 = vpop.permute.xlu0 %777  ;;  %v992_v11 = vmov 1966171168  }
 0x219   :  { %v826_v25 = vadd.f32 %v825_v1, %v805_v14  ;;  %v807_v26 = vmul.f32 %v763_v5, %v679_v22  ;;  %v783_v61 = vpop.permute.xlu1 %782  ;;  %v867_v12 = vunpack.c.l.s4 %v992_v11  ;;  %v869_v14 = vlaneseq }
 0x21a   :  { %v847_v16 = vadd.f32 %v846_v6, %v806_v13  ;;  %v808_v28 = vmul.f32 %v763_v5, %v680_v23  ;;  %v638_v15 = vpop.f32.mrb[20].mxu1 }
 0x21b   :  { %v827_v29 = vadd.f32 %v826_v25, %v807_v26  ;;  %v639_v30 = vadd.f32 %v638_v15, %v479_v19  ;;  %v640_v21 = vpop.f32.mrb[21].mxu1  ;;  %v860_v25 = vstv %s1295_s6  ;;  %v868_v26 = vunpack.c.0.s8 %v867_v12 }
 0x21c   :  { %v848_v31 = vadd.f32 %v847_v16, %v808_v28  ;;  %v641_v18 = vadd.f32 %v640_v21, %v479_v19  ;;  %v642_v32 = vpop.f32.mrb[22].mxu1  ;;  %vm883_vm2 = vcmp.lt.s32.totalorder %v869_v14, 256 }
 0x21d   :  { %v681_v33 = vmax.f32 %v639_v30, 0.0  ;;  %v643_v35 = vadd.f32 %v642_v32, %v484_v20  ;;  %v644_v34 = vpop.f32.mrb[23].mxu1 }
 0x21e   :  { %v682_v37 = vmax.f32 %v641_v18, 0.0  ;;  %v645_v2 = vadd.f32 %v644_v34, %v484_v20 }
 0x21f   :  { %v809_v38 = vmul.f32 %v768_v27, %v681_v33  ;;  %v683_v39 = vmax.f32 %v643_v35, 0.0 }
 0x220   :  { %v810_v42 = vmul.f32 %v768_v27, %v682_v37  ;;  %v684_v43 = vmax.f32 %v645_v2, 0.0  ;;  %v870_v27 = vshrl.u32 %v869_v14, 7 }
 0x221   :  { %v828_v44 = vadd.f32 %v827_v29, %v809_v38  ;;  %v811_v17 = vmul.f32 %v773_v41, %v683_v39 }
 0x222   :  { %v849_v45 = vadd.f32 %v848_v31, %v810_v42  ;;  %v812_v46 = vmul.f32 %v773_v41, %v684_v43  ;;  %v648_v47 = vpop.f32.mrb[24].mxu1  ;;  %v871_v30 = vsub.s32 %v868_v26, %v870_v27 }
 0x223   :  { %v829_v48 = vadd.f32 %v828_v44, %v811_v17  ;;  %v649_v49 = vadd.f32 %v648_v47, %v489_v24  ;;  %v650_v19 = vpop.f32.mrb[25].mxu1 }
 0x224   :  { %v850_v50 = vadd.f32 %v849_v45, %v812_v46  ;;  %v651_v52 = vadd.f32 %v650_v19, %v489_v24  ;;  %v652_v53 = vpop.f32.mrb[26].mxu1 }
 0x225   :  { %v685_v36 = vmax.f32 %v649_v49, 0.0  ;;  %v653_v54 = vadd.f32 %v652_v53, %v494_v40  ;;  %v654_v55 = vpop.f32.mrb[27].mxu1 }
 0x226   :  { %v686_v56 = vmax.f32 %v651_v52, 0.0  ;;  %v655_v58 = vadd.f32 %v654_v55, %v494_v40 }
 0x227   :  { %v813_v59 = vmul.f32 %v778_v57, %v685_v36  ;;  %v687_v60 = vmax.f32 %v653_v54, 0.0 }
 0x228   :  { %v814_v62 = vmul.f32 %v778_v57, %v686_v56  ;;  %v688_v63 = vmax.f32 %v655_v58, 0.0 }
 0x229   :  { %v830_v0 = vadd.f32 %v829_v48, %v813_v59  ;;  %v815_v20 = vmul.f32 %v783_v61, %v687_v60 }
 0x22a   :  { %v851_v1 = vadd.f32 %v850_v50, %v814_v62  ;;  %v816_v3 = vmul.f32 %v783_v61, %v688_v63 }
 0x22b   :  { %v831_v4 = vadd.f32 %v830_v0, %v815_v20 }
 0x22c   :  { %v852_v5 = vadd.f32 %v851_v1, %v816_v3 }
 0x22d   :  { %v832_v6 = vrot.slane %v831_v4, 4 }
 0x22e   :  { %v853_v7 = vrot.slane %v852_v5, 4 }
 0x22f   :  { %v833_v8 = vadd.f32 %v832_v6, %v831_v4 }
 0x230   :  { %v854_v9 = vadd.f32 %v853_v7, %v852_v5 }
 0x231   :  { %v834_v10 = vrot.slane %v833_v8, 2 }
 0x232   :  { %v855_v51 = vrot.slane %v854_v9, 2 }
 0x233   :  { %v835_v22 = vadd.f32 %v834_v10, %v833_v8 }
 0x234   :  { %v856_v13 = vadd.f32 %v855_v51, %v854_v9 }
 0x235   :  { %v836_v23 = vrot.slane %v835_v22, 1 }
 0x236   :  { %v857_v24 = vrot.slane %v856_v13, 1 }
 0x237   :  { %v837_v16 = vadd.f32 %v836_v23, %v835_v22 }
 0x238   :  { %v858_v28 = vadd.f32 %v857_v24, %v856_v13 }
 0x239   :  { %v861_v15 = vadd.f32 %v860_v25, %v837_v16 }
 0x23a   :  { %v862_v29 = vadd.f32 %v860_v25, %v858_v28 }
 0x23c   :  { %v865_v21 = vcombine.low %v861_v15, %v862_v29 }
 0x23e   :  { %v872_v31 = vrot.slane %v865_v21, %v871_v30 }
 0x240   :  { %v879_v18 = vrot.slane %v872_v31, %v871_v30 }
 0x242   :  { %885 = vst.msk [vmem:[#allocation3] sm:$0x3] %vm883_vm2, %v879_v18 }
 0x243   :  { %978 = shalt.err (!%p975_p4)
}
 0x244   :  { %s979_s9 = scalar_lea.hbm %s1296_s7, 32 }
 0x245   :  { %p980_p5 = scmp.ne.s32.totalorder %s1296_s7, %s979_s9  ;;  %p983_p6 = scmp.lt.u32.totalorder %s979_s9, %s1296_s7 }
 0x247   :  { %p985_p7 = pnand %p983_p6, %p980_p5 }
 0x249   :  { %988 = shalt.err (!%p985_p7)
}
 0x24a   :  { %895 = dma.vmem_to_hbm [thread:$0]  %s893_s30, 32, %s1296_s7, [#allocation4]  }
 0x24b   :  { %989 = dma.done.wait [#allocation4], 32  }
 0x24c   :  { %990 = vsyncadd [#allocation4], 4294967264 }
 0x24d   :  { %899 = vsyncpa [#allocation4], 1 }

</bundles_post_ra>
